<compile_context>
chip_gen: v6e
topology: v6e:2x2x1
jax: 0.10.0
libtpu: 0.0.40
codegen_flags: <defaults>
</compile_context>

<pallas_src>
import functools
import math

import jax
import jax.numpy as jnp
import numpy as np
from jax.experimental import pallas as pl
from jax.experimental.pallas import tpu as pltpu

GRID_MIN = -2.0
GRID_MAX = 2.0
NUM_GRIDS = 8
DENOMINATOR = (GRID_MAX - GRID_MIN) / (NUM_GRIDS - 1)

_MAX_SUBCHUNKS = 8  # max statically-unrolled sub-chunks per grid step


def _rbf_kernel(x_ref, gt_ref, r_ref, o_ref, *, g, cc, u_full, rem, c, cg,
                need_mask):
    # x_ref:  (TR, CG)       input block (cast to f32 in-kernel)
    # gt_ref: (1,  cc*G)     grid / denominator, channel-tiled (f32)
    # r_ref:  (cc, cc*G)     block-diagonal one-hot expansion / denominator
    # o_ref:  (TR, CG*G)     lane-dense output block
    tr = x_ref.shape[0]
    gt = gt_ref[...]                      # loaded once per grid step
    rm = r_ref[...]
    ch_base = pl.program_id(1) * cg if need_mask else None

    def emit(off, w):
        xs = x_ref[:, off:off + w].astype(jnp.float32)           # (TR, w)
        if need_mask:
            # Last (ragged) channel group: zero padding lanes so garbage can't
            # leak into valid outputs through the one-hot matmul (0 * NaN).
            ch = ch_base + off + jax.lax.broadcasted_iota(jnp.int32, (tr, w), 1)
            xs = jnp.where(ch < c, xs, 0.0)
        # MXU one-hot "repeat": xe[:, i*g+j] = xs[:, i] / denominator.
        # HIGHEST precision => full-f32 passes, so the selection is exact.
        xe = jnp.dot(xs, rm[:w, :w * g],
                     precision=jax.lax.Precision.HIGHEST,
                     preferred_element_type=jnp.float32)          # (TR, w*G)
        d = xe - gt[:, :w * g]
        o_ref[:, off * g:(off + w) * g] = jnp.exp(-(d * d)).astype(o_ref.dtype)

    for i in range(u_full):
        emit(i * cc, cc)
    if rem:
        emit(u_full * cc, rem)


def _pick_subchunk(c: int, g: int) -> int:
    # Sub-chunk width fed to the one-hot matmul.  Want: chunk*g a multiple of
    # 128 (unmasked stores), chunk <= ~64 (keeps the 6-pass MXU expansion well
    # under the HBM-write roofline on every generation), and chunk | C when
    # possible (no masked tail).
    unit = 128 // math.gcd(128, g)
    if c <= unit:
        return c
    cap = max(unit, (64 // unit) * unit)
    cc = min(cap, (c // unit) * unit)
    for w in range(cc, unit - 1, -unit):
        if c % w == 0:
            return w
    return cc


def _vmem_plan():
    # Per-generation output-block target and scoped-VMEM limit.
    phys = None
    try:
        phys = int(pltpu.get_tpu_info().vmem_capacity_bytes)
    except Exception:
        phys = None
    if not phys or phys <= 0:
        phys = 64 * 1024 * 1024          # conservative (v7x-sized) fallback
    vmem_limit = min(100 * 1024 * 1024, int(phys * 0.8))
    target_block = (12 * 1024 * 1024 if phys >= 96 * 1024 * 1024
                    else 8 * 1024 * 1024)
    return target_block, vmem_limit


def _pick_row_tile(m, cg, g, in_bytes, out_bytes, cc, target_block_bytes,
                   vmem_limit_bytes):
    if m <= 8:
        return m
    row_out = cg * g * out_bytes
    row_in = cg * in_bytes
    budget = int(vmem_limit_bytes * 0.85)

    def footprint(t):
        # 2x double-buffered out + 2x in + ~3 per-sub-chunk f32 temporaries.
        return 2 * t * row_out + 2 * t * row_in + 3 * t * cc * g * 4

    tr = max(8, (target_block_bytes // max(row_out, 1)) // 8 * 8)
    while tr > 8 and footprint(tr) > budget:
        tr = max(8, (tr // 2) // 8 * 8)

    # Balance into an even number of roughly equal row blocks so v7x's two
    # TensorCores both get work on the "parallel" rows axis.
    n_pairs = -(-m // (2 * tr))
    n_r = 2 * n_pairs
    tr_bal = ((-(-m // n_r)) + 7) // 8 * 8
    return max(8, min(tr, tr_bal))


def radial_basis_function(x: jax.Array,
                          grid: jax.Array,
                          denominator: float = DENOMINATOR,
                          out_dtype=None) -> jax.Array:
    """Pallas equivalent of RadialBasisFunction.forward."""
    orig_shape = x.shape
    c = int(orig_shape[-1])
    m = int(np.prod(orig_shape[:-1])) if len(orig_shape) > 1 else 1
    g = int(grid.shape[-1])

    # Default keeps torch's type promotion (f32 output for f32/bf16 inputs with
    # the f32 grid).  Passing out_dtype=jnp.bfloat16 halves the write stream
    # (documented deviation, opt-in only).
    if out_dtype is None:
        out_dtype = jnp.promote_types(x.dtype, grid.dtype)
    out_dtype = jnp.dtype(out_dtype)
    ib = jnp.dtype(x.dtype).itemsize
    ob = out_dtype.itemsize

    x2 = x.reshape(m, c)                       # no wrapper-side dtype cast
    inv_den = 1.0 / float(denominator)

    cc = _pick_subchunk(c, g)
    n_chunks = -(-c // cc)
    if n_chunks <= _MAX_SUBCHUNKS or (_MAX_SUBCHUNKS * cc) % 128 != 0:
        cg = c                                  # one channel group (full width)
        u_full, rem = c // cc, c % cc
        need_mask = False
    else:
        cg = _MAX_SUBCHUNKS * cc                # multiple of 128 by construction
        u_full, rem = _MAX_SUBCHUNKS, 0
        need_mask = (c % cg != 0)
    n_cg = -(-c // cg)

    # Constants: pre-scaled grid (channel-tiled) and the one-hot expansion
    # matrix with 1/denominator folded in.
    gt = jnp.tile(grid.reshape(1, g).astype(jnp.float32) * inv_den, (1, cc))
    rm = jnp.asarray(
        np.kron(np.eye(cc, dtype=np.float32),
                np.ones((1, g), dtype=np.float32)) * np.float32(inv_den))

    target_block, vmem_limit = _vmem_plan()
    tr = _pick_row_tile(m, cg, g, ib, ob, cc, target_block, vmem_limit)
    n_r = pl.cdiv(m, tr)

    kernel = functools.partial(_rbf_kernel, g=g, cc=cc, u_full=u_full, rem=rem,
                               c=c, cg=cg, need_mask=need_mask)

    cost = pl.CostEstimate(
        flops=int(2 * m * c * g * cc + 3 * m * c * g),
        transcendentals=int(m * c * g),
        bytes_accessed=int(m * c * ib + m * c * g * ob))

    out_flat = pl.pallas_call(
        kernel,
        out_shape=jax.ShapeDtypeStruct((m, c * g), out_dtype),
        grid_spec=pltpu.PrefetchScalarGridSpec(
            num_scalar_prefetch=0,
            grid=(n_r, n_cg),
            in_specs=[
                pl.BlockSpec((tr, cg), lambda i, j: (i, j)),
                pl.BlockSpec((1, cc * g), lambda i, j: (0, 0)),
                pl.BlockSpec((cc, cc * g), lambda i, j: (0, 0)),
            ],
            out_specs=pl.BlockSpec((tr, cg * g), lambda i, j: (i, j)),
        ),
        compiler_params=pltpu.CompilerParams(
            dimension_semantics=("parallel", "parallel"),
            vmem_limit_bytes=vmem_limit),
        cost_estimate=cost,
    )(x2, gt, rm)

    return out_flat.reshape(*orig_shape, g)


if __name__ == "__main__":
    # Deterministic parameter setup (mirrors __init__): grid = linspace(-2, 2, 8).
    grid = jnp.linspace(GRID_MIN, GRID_MAX, NUM_GRIDS, dtype=jnp.float32)

    # Small input consistent with the forward: (batch=2, seq=8, hidden=32).
    key = jax.random.PRNGKey(0)
    x = jax.random.normal(key, (2, 8, 32), dtype=jnp.float32)

    out = radial_basis_function(x, grid, DENOMINATOR)
    out = jax.block_until_ready(out)

    # Pure-JAX reference for a silent correctness check.
    ref = jnp.exp(-(((x[..., None] - grid) / DENOMINATOR) ** 2))
    assert out.shape == (2, 8, 32, NUM_GRIDS)
    assert np.allclose(np.asarray(out), np.asarray(ref), atol=1e-6, rtol=1e-6)

    print("KERNEL_OK")
</pallas_src>

<mosaic_0001>
module attributes {stable_mosaic.version = 11 : i64} {
  func.func @_rbf_kernel(%arg0: i32, %arg1: i32, %arg2: memref<8x32xf32, #tpu.memory_space<vmem>>, %arg3: memref<1x256xf32, #tpu.memory_space<vmem>>, %arg4: memref<32x256xf32, #tpu.memory_space<vmem>>, %arg5: memref<8x256xf32, #tpu.memory_space<vmem>>) attributes {dimension_semantics = [#tpu.dimension_semantics<parallel>, #tpu.dimension_semantics<parallel>], iteration_bounds = array<i64: 2, 1>, scalar_prefetch = 0 : i64, scratch_operands = 0 : i64, tpu.core_type = #tpu.core_type<tc>, window_params = [{transform_indices = @transform_0, window_bounds = array<i64: 8, 32>}, {pipeline_mode = #tpu.pipeline_mode<synchronous>, transform_indices = @transform_1, window_bounds = array<i64: 1, 256>}, {pipeline_mode = #tpu.pipeline_mode<synchronous>, transform_indices = @transform_2, window_bounds = array<i64: 32, 256>}, {transform_indices = @transform_3, window_bounds = array<i64: 8, 256>}]} {
    %c0 = arith.constant 0 : index
    %c0_0 = arith.constant 0 : index
    %0 = vector.load %arg3[%c0, %c0_0] : memref<1x256xf32, #tpu.memory_space<vmem>>, vector<1x256xf32>
    %c0_1 = arith.constant 0 : index
    %c0_2 = arith.constant 0 : index
    %1 = vector.load %arg4[%c0_1, %c0_2] : memref<32x256xf32, #tpu.memory_space<vmem>>, vector<32x256xf32>
    %c0_3 = arith.constant 0 : index
    %c0_4 = arith.constant 0 : index
    %2 = vector.load %arg2[%c0_3, %c0_4] : memref<8x32xf32, #tpu.memory_space<vmem>>, vector<8x32xf32>
    %cst = arith.constant dense<0.000000e+00> : vector<8x256xf32>
    %3 = tpu.matmul %2, %1, %cst {dimension_numbers = #tpu.dot_dimension_numbers<[1], [0], [0], [1], [0, 0, 1, 1], [], []>, precision = #tpu.contract_precision<fp32>} : vector<8x32xf32>, vector<32x256xf32>, vector<8x256xf32> -> vector<8x256xf32>
    %4 = vector.broadcast %0 : vector<1x256xf32> to vector<8x256xf32>
    %5 = arith.subf %3, %4 : vector<8x256xf32>
    %6 = arith.mulf %5, %5 : vector<8x256xf32>
    %cst_5 = arith.constant 0.000000e+00 : f32
    %7 = vector.broadcast %cst_5 : f32 to vector<8x256xf32>
    %8 = arith.subf %7, %6 : vector<8x256xf32>
    %9 = math.exp %8 : vector<8x256xf32>
    %c0_6 = arith.constant 0 : index
    %c0_7 = arith.constant 0 : index
    %10 = vector.load %arg5[%c0_6, %c0_7] : memref<8x256xf32, #tpu.memory_space<vmem>>, vector<8x256xf32>
    tpu.vector_store %arg5[%c0_6, %c0_7], %9 {strides = array<i32>} : memref<8x256xf32, #tpu.memory_space<vmem>>, vector<8x256xf32>,
    return
  }
  func.func @transform_0(%arg0: i32, %arg1: i32) -> (i32, i32) {
    %c0_i32 = arith.constant 0 : i32
    return %arg0, %arg1 : i32, i32
  }
  func.func @transform_1(%arg0: i32, %arg1: i32) -> (i32, i32) {
    %c0_i32 = arith.constant 0 : i32
    %c0_i32_0 = arith.constant 0 : i32
    %c0_i32_1 = arith.constant 0 : i32
    return %c0_i32, %c0_i32_0 : i32, i32
  }
  func.func @transform_2(%arg0: i32, %arg1: i32) -> (i32, i32) {
    %c0_i32 = arith.constant 0 : i32
    %c0_i32_0 = arith.constant 0 : i32
    %c0_i32_1 = arith.constant 0 : i32
    return %c0_i32, %c0_i32_0 : i32, i32
  }
  func.func @transform_3(%arg0: i32, %arg1: i32) -> (i32, i32) {
    %c0_i32 = arith.constant 0 : i32
    return %arg0, %arg1 : i32, i32
  }
}

</mosaic_0001>

<bundles_post_ra>
// kernel: tpu_custom_call.1
= control target key start
LH: loop header
LB: loop body
LE: loop exit
PB: predicated region body
PF: predicated region fallthrough
CT: control target
= control target key end

     0   :  { %8 = vsyncpa [#allocation3], 0  ;;  %s1508_s0 = inlined_call_operand.hbm [shape: f32[16,32], index: 0, kind: input, shape index: {}]   ;;  %s1509_s1 = inlined_call_operand.hbm [shape: f32[1,256], index: 1, kind: input, shape index: {}]   ;;  %s1510_s2 = inlined_call_operand.hbm [shape: f32[32,256], index: 2, kind: input, shape index: {}]   ;;  %s1511_s3 = inlined_call_operand.hbm [shape: f32[16,256], index: 3, kind: output, shape index: {}]  }
   0x1   :  { %10 = vsyncpa [#allocation3 + $0x1], 0 }
   0x2   :  { %11 = vsyncpa [#allocation6], 0 }
   0x3   :  { %12 = vsyncpa [#allocation4], 0 }
   0x4   :  { %14 = vsyncpa [#allocation4 + $0x1], 0  ;;  %s1231_s12 = smov 0   ;;  %s1233_s13 = smov 0  }
   0x5   :  { %s1235_s14 = smov 0   ;;  %s1237_s15 = smov 0  }
   0x6   :  { %s1239_s16 = smov 0   ;;  %s1241_s17 = smov 0  }
   0x7 LB: > { %s929_s18 = sadd.s32 4294967295, %s1202_s17   ;;  %s930_s19 = sadd.s32 4294967294, %s1202_s17   ;;  %s1202_s17 = sphi %s1241_s17, %s20_s17   ;;  %s1198_s16 = sphi %s1239_s16, %s1534_s16   ;;  %s1194_s15 = sphi %s1237_s15, %s1533_s15   ;;  %s1190_s14 = sphi %s1235_s14, %s1532_s14   ;;  %s1186_s13 = sphi %s1233_s13, %s1531_s13   ;;  %s1182_s12 = sphi %s1231_s12, %s1530_s12  }
   0x8   : > { %p54_p0 = scmp.ne.s32.totalorder %s1186_s13, %s1182_s12  ;;  %p1265_p1 = scmp.eq.s32.totalorder %s929_s18, 0 }
   0x9   : > { %p1269_p2 = scmp.eq.s32.totalorder %s929_s18, 1  ;;  %p128_p3 = scmp.eq.s32.totalorder %s930_s19, 1 }
   0xa   : > { %s1516_s20 = scalar_select %p1265_p1, 1, 0 }
   0xb   : > { %s1517_s21 = scalar_select %p1269_p2, 1, 0 }
   0xc   : > { %p1275_p4 = por %p1265_p1, %p54_p0  ;;  %p931_p5 = scmp.ge.s32.totalorder %s1202_s17, 1 }
   0xd   : > { %p1280_p6 = por %p128_p3, %p54_p0  ;;  %p135_p7 = scmp.lt.s32.totalorder %s1202_s17, 3 }
   0xe   : > { %s1518_s22 = scalar_select %p1275_p4, 1, 0 }
   0xf   : > { %s1519_s23 = scalar_select %p1280_p6, 1, 0 }
  0x10   : > { %p1285_p8 = pnand %p931_p5, %p135_p7  ;;  %s1204_s25 = smov [#allocation5]  }
  0x11   : > { %s148_s26 = sshll.u32 %s1204_s25, 4  ;;  %s1205_s27 = smov [#allocation7]   ;;  %s149_s26 = int_to_ptr.vmem [resolvable:$true] %s148_s26 }
  0x12   : > { %s1520_s24 = scalar_select %p1285_p8, 1, 0 }
  0x13   : > { %p960_p10 = pneg %p1285_p8  ;;  %s158_s28 = sshll.u32 %s1205_s27, 4  ;;  %s159_s28 = int_to_ptr.vmem [resolvable:$true] %s158_s28 }
  0x14   : > { %s1049_s30 = scalar_lea.vmem %s149_s26, 32  ;;  %p1057_p5 = scmp.lt.s32.totalorder %s149_s26, %s149_s26 }
  0x15   : > { %p1294_p11 = pnand %p960_p10, %p1265_p1  ;;  %p1050_p13 = scmp.ne.s32.totalorder %s149_s26, %s1049_s30 }
  0x16   : > { %p1058_p7 = scmp.lt.s32.totalorder %s1049_s30, %s1049_s30 }
  0x17   : > { %p1040_p12 = pneg %p1294_p11 }
  0x18   : > { %p1059_p9 = por %p1058_p7, %p1057_p5 }
  0x19   : > { %p1052_p0 = pnand %p1050_p13, %p1040_p12 }
  0x1b   : > { %p1053_p3 = pneg %p1052_p0 }
  0x1d   : > { %p1060_p6 = pnand %p1059_p9, %p1053_p3 }
  0x1f   : > { %1063 = shalt.err (!%p1060_p6)
}
  0x20   : > { %963 = dma.hbm_to_vmem [thread:$0]  (!%p1294_p11), %s1509_s1, 32, %s149_s26, [#allocation6]  }
  0x21   : > { %s1075_s6 = scalar_lea.vmem %s159_s28, 1024  ;;  %p1083_p13 = scmp.lt.s32.totalorder %s159_s28, %s159_s28 }
  0x22   : > { %p1076_p10 = scmp.ne.s32.totalorder %s159_s28, %s1075_s6  ;;  %p1084_p0 = scmp.lt.s32.totalorder %s1075_s6, %s1075_s6 }
  0x24   : > { %p1078_p1 = pnand %p1076_p10, %p1040_p12  ;;  %p1085_p8 = por %p1084_p0, %p1083_p13 }
  0x26   : > { %p1079_p4 = pneg %p1078_p1 }
  0x28   : > { %p1086_p2 = pnand %p1085_p8, %p1079_p4 }
  0x2a   : > { %1089 = shalt.err (!%p1086_p2)
}
  0x2b   : > { %s1206_s7 = smov 256   ;;  %s1207_s8 = smov 16  }
  0x2c   : > { %966 = dma.hbm_to_vmem [thread:$0]  (!%p1294_p11), %s1510_s2, 1024, %s159_s28, [#allocation6], %s1206_s7, %s1206_s7, %s1207_s8  }
  0x2d   : > { %s32_s11 = sadd.s32 1, %s1198_s16  ;;  %s41_s18 = sadd.s32 1, %s1190_s14 }
  0x2e   : > { %p34_p1 = scmp.ge.s32.totalorder %s32_s11, 2  ;;  %p48_p2 = scmp.ne.s32.totalorder %s1190_s14, %s1186_s13 }
  0x2f   : > { %p49_p4 = scmp.eq.s32.totalorder %s1202_s17, 0  ;;  %p977_p6 = scmp.lt.s32.totalorder %s1202_s17, 2 }
  0x30   : > { %s1536_s11 = smov (%p34_p1, %s32_s11), 0  ;;  %p1522_p9 = scmp.ne.s32.totalorder %s1517_s21, 0 }
  0x31   : > { %p50_p8 = por %p49_p4, %p48_p2  ;;  %s36_s25 = ssub.s32 %s1198_s16, %s1536_s11 }
  0x32   : > { %p1326_p12 = por %p1522_p9, %p48_p2  ;;  %s172_s26 = sand.u32 1, %s1190_s14  }
  0x33   : > { %p39_p3 = scmp.eq.s32.totalorder %s36_s25, 0  ;;  %s935_s27 = sshll.u32 %s172_s26, 3 }
  0x34   : > { %s936_s28 = sshll.u32 %s1198_s16, 7  ;;  %s176_s6 = scalar_lea.vmem [#allocation2], %s935_s27 }
  0x35   : > { %s1335_s29 = scalar_select %p39_p3, %s1190_s14, %s41_s18  }
  0x36   : > { %s182_s5 = scalar_lea.hbm %s1508_s0, %s936_s28  ;;  %s184_s7 = sshll.u32 %s176_s6, 4  ;;  %s185_s7 = int_to_ptr.vmem [resolvable:$true] %s184_s7 }
  0x37   : > { %p1342_p11 = pnand %p977_p6, %p50_p8  ;;  %s173_s8 = scalar_lea.sflag [#allocation3], %s172_s26 }
  0x38   : > { %s1103_s9 = scalar_lea.vmem %s185_s7, 128  ;;  %s1208_s10 = smov [#allocation2]  }
  0x39   : > { %p1092_p5 = pneg %p1342_p11  ;;  %p1104_p7 = scmp.ne.s32.totalorder %s185_s7, %s1103_s9 }
  0x3a   : > { %s1108_s18 = sshll.u32 %s1208_s10, 4  ;;  %s1109_s18 = int_to_ptr.vmem [resolvable:$false] %s1108_s18 }
  0x3b   : > { %p1106_p10 = pnand %p1104_p7, %p1092_p5  ;;  %s1110_s25 = scalar_lea.vmem %s1109_s18, 256 }
  0x3c   : > { %p1111_p0 = scmp.lt.s32.totalorder %s185_s7, %s1109_s18  ;;  %p1112_p1 = scmp.lt.s32.totalorder %s1110_s25, %s1103_s9 }
  0x3d   : > { %p1107_p13 = pneg %p1106_p10 }
  0x3e   : > { %p1113_p2 = por %p1112_p1, %p1111_p0 }
  0x40   : > { %p1114_p4 = pnand %p1113_p2, %p1107_p13 }
  0x42   : > { %1117 = shalt.err (!%p1114_p4)
}
  0x43   : > { %970 = dma.hbm_to_vmem [thread:$0]  (!%p1342_p11), %s182_s5, 128, %s185_s7, %s173_s8  }
  0x44   : > { %p1525_p6 = scmp.ne.s32.totalorder %s1520_s24, 0 }
  0x45   : > { %s1353_s26 = sand.u32 (!%p1525_p6), 1, %s1186_s13   ;;  %p1526_p8 = scmp.ne.s32.totalorder (!%p1525_p6), %s1518_s22, 0 }
  0x46   : > { %193 = sbr.rel (%p1525_p6) target bundleno = 350 (0x15e), region = 32  ;;  %s938_s27 = sshll.u32 (!%p1525_p6), %s1353_s26, 3 }
  0x47   : > { %s196_s28 = scalar_lea.sflag (!%p1525_p6), [#allocation3], %s1353_s26  ;;  %s199_s30 = scalar_lea.vmem (!%p1525_p6), [#allocation2], %s938_s27 }
  0x4b   : > { %1169 = dma.done.wait (%p1526_p8), %s196_s28, 128  }
  0x4c   : > { %1171 = vsyncadd (%p1526_p8), %s196_s28, 4294967168  ;;  %p1527_p9 = scmp.ne.s32.totalorder %s1516_s20, 0 }
  0x4e   : > { %1173 = dma.done.wait (%p1527_p9), [#allocation6], 1056  }
  0x4f   : > { %1175 = vsyncadd (%p1527_p9), [#allocation6], 4294966240  ;;  %v1209_v0 = vmov 0.0   ;;  %v239_v1 = vld [vmem:[#allocation7 + $0x38] sm:$0xff]  ;;  %v238_v2 = vld [vmem:[#allocation7 + $0x30] sm:$0xff]  ;;  %vm241_vm0 = vcmask 261120   ;;  %v789_v59 = vlaneseq }
  0x50   : > { %317 = vmatprep.mubr.f32.mxu0 %v1209_v0  ;;  %433 = vmatprep.mubr.f32.mxu1 %v1209_v0  ;;  %v237_v3 = vld [vmem:[#allocation7 + $0x28] sm:$0xff]  ;;  %v1367_v4 = vand.u32 4294901760, %v239_v1  ;;  %v1369_v5 = vand.u32 4294901760, %v238_v2  ;;  %v236_v7 = vld [vmem:[#allocation7 + $0x20] sm:$0xff]  ;;  %v235_v8 = vld [vmem:[#allocation7 + $0x18] sm:$0xff]  ;;  %s941_s20 = sshll.u32 %s1353_s26, 4 }
  0x51   : > { %v1371_v6 = vand.u32 4294901760, %v237_v3  ;;  %v234_v9 = vld [vmem:[#allocation7 + $0x10] sm:$0xff]  ;;  %v1373_v10 = vand.u32 4294901760, %v236_v7  ;;  %v1375_v11 = vand.u32 4294901760, %v235_v8  ;;  %v233_v13 = vld [vmem:[#allocation7 + $0x8] sm:$0xff]  ;;  %v232_v14 = vld [vmem:[#allocation7] sm:$0xff] }
  0x52   : > { %v1377_v12 = vand.u32 4294901760, %v234_v9  ;;  %v240_v15 = vld [vmem:[%s199_s30] sm:$0xff]  ;;  %270 = vmatprep.subr.mxu0 %v1367_v4  ;;  %v1380_v16 = vand.u32 4294901760, %v233_v13  ;;  %v1383_v17 = vsub.f32 %v239_v1, %v1367_v4  ;;  %v1385_v18 = vand.u32 4294901760, %v232_v14  ;;  %s947_s22 = sshll.u32 %s1194_s15, 8  ;;  %s229_s24 = scalar_lea.vmem [#allocation8], %s941_s20 }
  0x53   : > { %v1388_v19 = vsub.f32 %v238_v2, %v1369_v5  ;;  %272 = vmatpush1.msra.mxu0 %v1369_v5  ;;  %v1392_v20 = vsub.f32 %v237_v3, %v1371_v6  ;;  %v243_v21 = vsel %vm241_vm0, %v240_v15, 0  ;;  %v1396_v22 = vsub.f32 %v236_v7, %v1373_v10  ;;  %s828_s4 = sshll.u32 %s229_s24, 4  ;;  %s1466_s7 = scalar_lea.hbm %s1511_s3, %s947_s22  ;;  %s829_s4 = int_to_ptr.vmem [resolvable:$true] %s828_s4 }
  0x54   : > { %v1399_v23 = vsub.f32 %v235_v8, %v1375_v11  ;;  %274 = vmatprep.subr.mxu0 %v1371_v6  ;;  %v355_v24 = vand.u32 4294901760, %v1383_v17  ;;  %v1404_v26 = vand.u32 4294901760, %v243_v21  ;;  %v1407_v27 = vsub.f32 %v234_v9, %v1377_v12  ;;  %v231_v9 = vld [vmem:[#allocation5] sm:$0x3]  ;;  %s812_s21 = scalar_lea.sflag [#allocation4], %s1353_s26  ;;  %s1118_s8 = scalar_lea.vmem %s829_s4, 256 }
  0x55   : > { %v361_v25 = vand.u32 4294901760, %v1388_v19  ;;  %276 = vmatpush1.msra.mxu0 %v1373_v10  ;;  %v367_v28 = vand.u32 4294901760, %v1392_v20  ;;  %v373_v29 = vand.u32 4294901760, %v1396_v22  ;;  %v1414_v31 = vsub.f32 %v233_v13, %v1380_v16  ;;  %p1119_p3 = scmp.ne.s32.totalorder %s829_s4, %s1118_s8  ;;  %s1210_s9 = smov [#allocation8]  }
  0x56   : > { %v379_v30 = vand.u32 4294901760, %v1399_v23  ;;  %278 = vmatprep.subr.mxu0 %v1375_v11  ;;  %v356_v32 = vsub.f32 %v1383_v17, %v355_v24  ;;  %v319_v34 = vsub.f32 %v243_v21, %v1404_v26  ;;  %v385_v35 = vand.u32 4294901760, %v1407_v27  ;;  %s1122_s15 = sshll.u32 %s1210_s9, 4  ;;  %s1123_s15 = int_to_ptr.vmem [resolvable:$false] %s1122_s15 }
  0x57   : > { %v362_v33 = vsub.f32 %v1388_v19, %v361_v25  ;;  %280 = vmatpush1.msra.mxu0 %v1377_v12  ;;  %v368_v36 = vsub.f32 %v1392_v20, %v367_v28  ;;  %v374_v37 = vsub.f32 %v1396_v22, %v373_v29  ;;  %v391_v39 = vand.u32 4294901760, %v1414_v31  ;;  %p1120_p11 = pnand %p1119_p3, %p1326_p12  ;;  %s1124_s10 = scalar_lea.vmem %s1123_s15, 512 }
  0x58   : > { %v380_v38 = vsub.f32 %v1399_v23, %v379_v30  ;;  %282 = vmatprep.subr.mxu0 %v1380_v16  ;;  %v357_v40 = vand.u32 4294901760, %v356_v32  ;;  %v320_v42 = vand.u32 4294901760, %v319_v34  ;;  %v386_v43 = vsub.f32 %v1407_v27, %v385_v35  ;;  %p1125_p7 = scmp.lt.s32.totalorder %s829_s4, %s1123_s15  ;;  %p1126_p10 = scmp.lt.s32.totalorder %s1124_s10, %s1118_s8 }
  0x59   : > { %v363_v41 = vand.u32 4294901760, %v362_v33  ;;  %284 = vmatpush1.msra.mxu0 %v1385_v18  ;;  %v369_v44 = vand.u32 4294901760, %v368_v36  ;;  %v375_v45 = vand.u32 4294901760, %v374_v37  ;;  %v392_v46 = vsub.f32 %v1414_v31, %v391_v39  ;;  %p1121_p5 = pneg %p1120_p11 }
  0x5a   : > { %358 = vmatprep.subr.mxu1 %v357_v40  ;;  %467 = vmatprep.subr.mxu0 %v1383_v17  ;;  %v321_v47 = vsub.f32 %v319_v34, %v320_v42  ;;  %v381_v48 = vand.u32 4294901760, %v380_v38  ;;  %v396_v49 = vsub.f32 %v232_v14, %v1385_v18  ;;  %v387_v50 = vand.u32 4294901760, %v386_v43  ;;  %p1127_p13 = por %p1126_p10, %p1125_p7 }
  0x5b   : > { %364 = vmatpush1.msra.mxu1 %v363_v41  ;;  %v393_v52 = vand.u32 4294901760, %v392_v46 }
  0x5c   : > { %370 = vmatprep.subr.mxu1 %v369_v44  ;;  %v322_v51 = vand.u32 4294901760, %v321_v47  ;;  %v397_v53 = vand.u32 4294901760, %v396_v49  ;;  %p1128_p0 = pnand %p1127_p13, %p1121_p5 }
  0x5d   : > { %376 = vmatpush1.msra.mxu1 %v375_v45 }
  0x5e   : > { %323 = vmatmul.mubr.f32.vlgmr.msra.gmra.mxu0 %v322_v51  ;;  %382 = vmatprep.subr.mxu1 %v381_v48  ;;  %v398_v54 = vsub.f32 %v396_v49, %v397_v53 }
  0x5f   : > { %470 = vmatpush1.msra.mxu0 %v1388_v19  ;;  %388 = vmatpush1.msra.mxu1 %v387_v50 }
  0x60   : > { %473 = vmatprep.subr.mxu0 %v1392_v20  ;;  %394 = vmatprep.subr.mxu1 %v393_v52  ;;  %v399_v55 = vand.u32 4294901760, %v398_v54 }
  0x61   : > { %476 = vmatpush1.msra.mxu0 %v1396_v22  ;;  %521 = vmatprep.mubr.f32.mxu0 %v1209_v0 }
  0x62   : > { %479 = vmatprep.subr.mxu0 %v1399_v23  ;;  %400 = vmatpush1.msra.mxu1 %v399_v55 }
  0x63   : > { %482 = vmatpush1.msra.mxu0 %v1407_v27  ;;  %435 = vmatmul.mubr.f32.vlgmr.msra.gmra.mxu1 %v1404_v26 }
  0x64   : > { %485 = vmatprep.subr.mxu0 %v1414_v31  ;;  %555 = vmatprep.subr.mxu1 %v1367_v4 }
  0x65   : > { %488 = vmatpush1.msra.mxu0 %v396_v49  ;;  %557 = vmatpush1.msra.mxu1 %v1369_v5 }
  0x66   : > { %524 = vmatmul.mubr.f32.vlgmr.msra.gmra.mxu0 %v319_v34  ;;  %559 = vmatprep.subr.mxu1 %v1371_v6 }
  0x67   : > { %639 = vmatprep.subr.mxu0 %v355_v24  ;;  %561 = vmatpush1.msra.mxu1 %v1373_v10 }
  0x68   : > { %643 = vmatpush1.msra.mxu0 %v361_v25  ;;  %563 = vmatprep.subr.mxu1 %v1375_v11 }
  0x69   : > { %647 = vmatprep.subr.mxu0 %v367_v28  ;;  %565 = vmatpush1.msra.mxu1 %v1377_v12 }
  0x6a   : > { %651 = vmatpush1.msra.mxu0 %v373_v29  ;;  %567 = vmatprep.subr.mxu1 %v1380_v16 }
  0x6b   : > { %655 = vmatprep.subr.mxu0 %v379_v30  ;;  %569 = vmatpush1.msra.mxu1 %v1385_v18 }
  0x6c   : > { %602 = vmatprep.mubr.f32.mxu1 %v1209_v0  ;;  %659 = vmatpush1.msra.mxu0 %v385_v35 }
  0x6d   : > { %606 = vmatmul.mubr.f32.vlgmr.msra.gmra.mxu1 %v320_v42  ;;  %663 = vmatprep.subr.mxu0 %v391_v39 }
  0x6e   : > { %733 = vmatprep.subr.mxu1 %v1367_v4  ;;  %667 = vmatpush1.msra.mxu0 %v397_v53 }
  0x6f   : > { %700 = vmatprep.mubr.f32.mxu0 %v1209_v0  ;;  %735 = vmatpush1.msra.mxu1 %v1369_v5 }
  0x70   : > { %702 = vmatmul.mubr.f32.vlgmr.msra.gmra.mxu0 %v1404_v26  ;;  %737 = vmatprep.subr.mxu1 %v1371_v6 }
  0x71   : > { %739 = vmatpush1.msra.mxu1 %v1373_v10  ;;  %780 = vmatprep.mubr.f32.mxu1 %v1209_v0  ;;  %v790_v0 = vshrl.u32 %v789_v59, 7 }
  0x72   : > { %741 = vmatprep.subr.mxu1 %v1375_v11 }
  0x73   : > { %743 = vmatpush1.msra.mxu1 %v1377_v12  ;;  %v791_v8 = vsub.s32 0, %v790_v0  ;;  %v795_v11 = vsub.s32 1, %v790_v0 }
  0x74   : > { %745 = vmatprep.subr.mxu1 %v1380_v16 }
  0x75   : > { %747 = vmatpush1.msra.mxu1 %v1385_v18  ;;  %v792_v14 = vrot.slane %v231_v9, %v791_v8  ;;  %v796_v18 = vrot.slane %v231_v9, %v795_v11 }
  0x76   : > { %782 = vmatmul.mubr.f32.vlgmr.msra.gmra.mxu1 %v1404_v26 }
 0x11e   : > { %v324_v56 = vpop.f32.mrf.mxu0 }
 0x120   : > { %v326_v57 = vpop.f32.mrf.mxu0 }
 0x123   : > { %v436_v58 = vpop.f32.mrf.mxu1 }
 0x124   : > { %v437_v62 = vadd.f32 %v436_v58, %v324_v56 }
 0x125   : > { %v438_v60 = vpop.f32.mrf.mxu1 }
 0x126   : > { %v525_v61 = vpop.f32.mrf.mxu0  ;;  %v439_v63 = vadd.f32 %v438_v60, %v326_v57 }
 0x127   : > { %v526_v3 = vadd.f32 %v525_v61, %v437_v62 }
 0x128   : > { %v527_v2 = vpop.f32.mrf.mxu0 }
 0x129   : > { %v528_v6 = vadd.f32 %v527_v2, %v439_v63 }
 0x12d   : > { %v607_v1 = vpop.f32.mrf.mxu1 }
 0x12e   : > { %v608_v7 = vadd.f32 %v607_v1, %v526_v3 }
 0x12f   : > { %v609_v4 = vpop.f32.mrf.mxu1 }
 0x130   : > { %v703_v5 = vpop.f32.mrf.mxu0  ;;  %v610_v10 = vadd.f32 %v609_v4, %v528_v6 }
 0x131   : > { %v704_v13 = vadd.f32 %v703_v5, %v608_v7 }
 0x132   : > { %v705_v12 = vpop.f32.mrf.mxu0 }
 0x133   : > { %v706_v16 = vadd.f32 %v705_v12, %v610_v10 }
 0x136   : > { %v783_v15 = vpop.f32.mrf.mxu1 }
 0x137   : > { %v784_v17 = vadd.f32 %v783_v15, %v704_v13 }
 0x138   : > { %v785_v19 = vpop.f32.mrf.mxu1 }
 0x139   : > { %v799_v20 = vsub.f32 %v784_v17, %v792_v14  ;;  %v786_v21 = vadd.f32 %v785_v19, %v706_v16 }
 0x13b   : > { %v801_v22 = vmul.f32 %v799_v20, %v799_v20  ;;  %v800_v23 = vsub.f32 %v786_v21, %v796_v18 }
 0x13d   : > { %v803_v24 = vsub.f32 0.0, %v801_v22  ;;  %v802_v25 = vmul.f32 %v800_v23, %v800_v23 }
 0x13f   : > { %v805_v26 = vmul.f32 1.442695, %v803_v24  ;;  %v804_v27 = vsub.f32 0.0, %v802_v25 }
 0x141   : > { %1034 = vpow2.f32 %v805_v26  ;;  %v807_v28 = vmul.f32 1.442695, %v804_v27 }
 0x143   : > { %1036 = vpow2.f32 %v807_v28 }
 0x14e   : > { %v1035_v29 = vpop.eup %1034 }
 0x14f   : > { %809 = vst [vmem:[%s229_s24] sm:$0xff] %v1035_v29 }
 0x150   : > { %v1037_v30 = vpop.eup %1036 }
 0x151   : > { %810 = vst [vmem:[%s229_s24 + $0x8] sm:$0xff] %v1037_v30 }
 0x152   : > { %1131 = shalt.err (!%p1128_p0)
}
 0x153   : > { %s1132_s18 = scalar_lea.hbm %s1466_s7, 256  ;;  %s1136_s27 = scalar_lea.hbm %s1511_s3, 512 }
 0x154   : > { %p1133_p1 = scmp.ne.s32.totalorder %s1466_s7, %s1132_s18  ;;  %p1137_p6 = scmp.lt.s32.totalorder %s1466_s7, %s1511_s3 }
 0x155   : > { %p1138_p8 = scmp.lt.s32.totalorder %s1136_s27, %s1132_s18 }
 0x156   : > { %p1134_p2 = pnand %p1133_p1, %p1326_p12 }
 0x157   : > { %p1139_p9 = por %p1138_p8, %p1137_p6 }
 0x158   : > { %p1135_p4 = pneg %p1134_p2 }
 0x15a   : > { %p1140_p3 = pnand %p1139_p9, %p1135_p4 }
 0x15c   : > { %1143 = shalt.err (!%p1140_p3)
}
 0x15d   : > { %958 = dma.vmem_to_hbm [thread:$0]  (%p1326_p12), %s829_s4, 256, %s1466_s7, %s812_s21  }
 0x15e PF: > { %s840_s20 = sand.u32 1, %s1182_s12   ;;  %p1528_p11 = scmp.ne.s32.totalorder %s1519_s23, 0 }
 0x15f   : > { %p1529_p5 = scmp.ge.s32.totalorder %s1202_s17, 2  ;;  %s841_s22 = scalar_lea.sflag [#allocation4], %s840_s20 }
 0x161   : > { %p972_p7 = pnand %p1529_p5, %p1528_p11 }
 0x163   : > { %p973_p10 = pneg %p972_p7 }
 0x165   : > { %1177 = dma.done.wait (%p973_p10), %s841_s22, 256  }
 0x166   : > { %1179 = vsyncadd (%p973_p10), %s841_s22, 4294967040  ;;  %s20_s17 = sadd.s32 1, %s1202_s17   ;;  %s1530_s12 = smov %s1186_s13 }
 0x167   : > { %p17_p13 = scmp.ge.s32.totalorder %s20_s17, 4   ;;  %s1531_s13 = smov %s1190_s14 }
 0x168   : > { %s1532_s14 = smov %s1335_s29  ;;  %s1533_s15 = smov %s1198_s16 }
 0x169   : > { %s1534_s16 = smov %s1536_s11  ;;  %19 = sbr.rel (!%p17_p13) target bundleno = 7 (0x7), region = 85 }
 0x16e   :  { %846 = vsyncpa [#allocation3], 1 }
 0x16f   :  { %848 = vsyncpa [#allocation3 + $0x1], 1 }
 0x170   :  { %849 = vsyncpa [#allocation6], 1 }
 0x171   :  { %850 = vsyncpa [#allocation4], 1 }
 0x172   :  { %852 = vsyncpa [#allocation4 + $0x1], 1 }

</bundles_post_ra>
